<compile_context>
chip_gen: v5e
topology: v5e:2x2
jax: 0.10.0
libtpu: 0.0.40
codegen_flags: <defaults>
</compile_context>

<pallas_src>
import jax
import jax.numpy as jnp
from jax.experimental import pallas as pl
from jax.experimental.pallas import tpu as pltpu


# -----------------------------------------------------------------------------
# Kernel: the full forward pass (9 Linear layers + tanh / sigmoid) fused.
# Packed-weight row layout (all offsets static):
#   [0 : inSize)                encoder L1  (inSize -> inSize/2)
#   [o+0   : o+128)             encoder L2  (padded to 128x128)
#   [o+128 : o+256)             encoder L3
#   [o+256 : o+384)             fused decoder/classifier L1 ([wd1 || wc1])
#   [o+384 : o+512)             decoder L2  (rows d4:128 zero -> masks cls half)
#   [o+512 : o+640)             classifier L2 (rows 0:d4 zero -> masks dec half)
#   [o+640 : o+768)             classifier L3
# where o = inSize.  Bias table rows: e1,e2,e3,branch1,d2,d3,c2,c3.
# -----------------------------------------------------------------------------
def autoencoder_kernel(x_ref, wa_ref, wd3_ref, b_ref,
                       enc_ref, dec_ref, lab_ref):
    in_size = x_ref.shape[-1]
    o = in_size

    def lin(h, row_start, bias_row, out_w=128, n_rows=128):
        w = wa_ref[row_start:row_start + n_rows, :]
        acc = jnp.dot(h.astype(jnp.bfloat16), w,
                      preferred_element_type=jnp.float32)
        return acc + b_ref[bias_row:bias_row + 1, 0:out_w]

    x = x_ref[...].astype(jnp.float32)

    # --- encoder: Linear -> Tanh -> Linear -> Tanh -> Linear ------------------
    h = jnp.tanh(lin(x, 0, 0, n_rows=in_size))       # inSize   -> inSize/2
    h = jnp.tanh(lin(h, o, 1))                       # inSize/2 -> inSize/4 (padded)
    encoded = lin(h, o + 128, 2)                     # inSize/4 -> inSize/8 (padded)
    enc_ref[...] = encoded.astype(enc_ref.dtype)     # cols >= inSize/8 are exact 0

    # --- fused first layer of decoder & classifier (shared LHS = encoded) -----
    # cols 0:inSize/4 -> decoder hidden, cols inSize/4:inSize/2 -> classifier.
    bh = jnp.tanh(lin(encoded, o + 256, 3))

    # --- decoder: Tanh -> Linear -> Tanh -> Linear -> Sigmoid -----------------
    dh = jnp.tanh(lin(bh, o + 384, 4))               # zero rows mask cls half
    dec = jnp.dot(dh.astype(jnp.bfloat16), wd3_ref[...],
                  preferred_element_type=jnp.float32)
    dec = dec + b_ref[5:6, 0:in_size]
    dec_ref[...] = jax.nn.sigmoid(dec).astype(dec_ref.dtype)

    # --- classifier: Tanh -> Linear -> Tanh -> Linear(16) -> Sigmoid ----------
    ch = jnp.tanh(lin(bh, o + 512, 6))               # zero rows mask dec half
    lab = jax.nn.sigmoid(lin(ch, o + 640, 7))
    lab_ref[...] = lab.astype(lab_ref.dtype)         # cols >= 16 sliced by wrapper


# -----------------------------------------------------------------------------
# Host-side packing of the 9 (w, b) pairs into 3 buffers (done once).
# -----------------------------------------------------------------------------
def pack_params(params):
    ((we1, be1), (we2, be2), (we3, be3),
     (wd1, bd1), (wd2, bd2), (wd3, bd3),
     (wc1, bc1), (wc2, bc2), (wc3, bc3)) = params

    in_size = we1.shape[0]
    d2, d4 = in_size // 2, in_size // 4
    assert in_size % 128 == 0 and d2 <= 128, \
        "packing scheme assumes inSize in {128, 256}"

    def pad_to(w, rows, cols):
        return jnp.pad(w, ((0, rows - w.shape[0]), (0, cols - w.shape[1])))

    wb1 = jnp.concatenate([wd1, wc1], axis=1)        # fused branch-1 weight
    bb1 = jnp.concatenate([bd1, bc1], axis=1)

    blocks = [
        pad_to(we1, in_size, 128),                                     # enc L1
        pad_to(we2, 128, 128),                                         # enc L2
        pad_to(we3, 128, 128),                                         # enc L3
        pad_to(wb1, 128, 128),                                         # dec/cls L1 fused
        pad_to(wd2, 128, 128),                                         # dec L2 (rows 0:d4)
        jnp.pad(wc2, ((d4, 128 - 2 * d4), (0, 128 - wc2.shape[1]))),   # cls L2 (rows d4:2d4)
        pad_to(wc3, 128, 128),                                         # cls L3
    ]
    w_a = jnp.concatenate(blocks, axis=0).astype(jnp.bfloat16)   # (inSize+768, 128)
    w_b = pad_to(wd3, 128, in_size).astype(jnp.bfloat16)         # (128, inSize)

    bw = max(128, in_size)

    def pad_b(b):
        return jnp.pad(b, ((0, 0), (0, bw - b.shape[1])))

    biases = jnp.concatenate(
        [pad_b(b) for b in (be1, be2, be3, bb1, bd2, bd3, bc2, bc3)],
        axis=0).astype(jnp.float32)                               # (8, bw)
    return w_a, w_b, biases


# -----------------------------------------------------------------------------
# Wrapper
# -----------------------------------------------------------------------------
def autoencoder_forward(x, packed_params):
    """x: (B, inSize) f32.  Returns (encoded, decoded, label)."""
    w_a, w_b, biases = packed_params
    B, in_size = x.shape
    assert w_b.shape[1] == in_size

    # Batch tile: shard across TensorCores when the batch is large.
    tb = B
    for cand in (256, 128):
        if B % cand == 0:
            tb = cand
            break
    grid = (B // tb,)

    out_shape = (
        jax.ShapeDtypeStruct((B, 128), x.dtype),       # encoded (lane-padded)
        jax.ShapeDtypeStruct((B, in_size), x.dtype),   # decoded
        jax.ShapeDtypeStruct((B, 128), x.dtype),       # label   (lane-padded)
    )

    def const(shape):
        return pl.BlockSpec(shape, lambda i: (0,) * len(shape))

    def batched(cols):
        return pl.BlockSpec((tb, cols), lambda i: (i, 0))

    cost = pl.CostEstimate(
        flops=2 * B * (w_a.size + w_b.size),
        transcendentals=B * (5 * 128 + in_size),
        bytes_accessed=(x.nbytes + w_a.nbytes + w_b.nbytes + biases.nbytes
                        + B * (128 + in_size + 128) * x.dtype.itemsize),
    )

    enc_pad, decoded, lab_pad = pl.pallas_call(
        autoencoder_kernel,
        out_shape=out_shape,
        grid=grid,
        in_specs=[
            batched(in_size),     # x
            const(w_a.shape),     # packed weight slab (VMEM-resident)
            const(w_b.shape),     # decoder L3 weight
            const(biases.shape),  # packed biases
        ],
        out_specs=(batched(128), batched(in_size), batched(128)),
        compiler_params=pltpu.CompilerParams(
            dimension_semantics=("parallel",)),
        cost_estimate=cost,
    )(x, w_a, w_b, biases)

    encoded = enc_pad[:, : in_size // 8]
    label = lab_pad[:, :16]
    return encoded, decoded, label


# -----------------------------------------------------------------------------
# Deterministic parameter init (PyTorch nn.Linear-style U(-1/sqrt(fan_in), ...))
# -----------------------------------------------------------------------------
def init_linear(key, fan_in, fan_out):
    kw, kb = jax.random.split(key)
    bound = 1.0 / float(fan_in) ** 0.5
    w = jax.random.uniform(kw, (fan_in, fan_out), jnp.float32, -bound, bound)
    b = jax.random.uniform(kb, (1, fan_out), jnp.float32, -bound, bound)
    return w, b


def init_autoencoder_params(key, xn, yn):
    in_size = xn * yn
    d2, d4, d8 = in_size // 2, in_size // 4, in_size // 8
    dims = [
        (in_size, d2), (d2, d4), (d4, d8),          # encoder
        (d8, d4), (d4, d2), (d2, in_size),          # decoder
        (d8, d4), (d4, d2), (d2, 16),               # classifier
    ]
    keys = jax.random.split(key, len(dims))
    return [init_linear(k, fi, fo) for k, (fi, fo) in zip(keys, dims)]


# Pure-JAX reference with the same bf16 weight / bf16-LHS rounding as the kernel.
def reference_forward(x, params):
    def lin(h, w, b):
        return jnp.dot(h.astype(jnp.bfloat16), w.astype(jnp.bfloat16),
                       preferred_element_type=jnp.float32) + b

    h = jnp.tanh(lin(x, *params[0]))
    h = jnp.tanh(lin(h, *params[1]))
    encoded = lin(h, *params[2])

    d = jnp.tanh(lin(encoded, *params[3]))
    d = jnp.tanh(lin(d, *params[4]))
    decoded = jax.nn.sigmoid(lin(d, *params[5]))

    c = jnp.tanh(lin(encoded, *params[6]))
    c = jnp.tanh(lin(c, *params[7]))
    label = jax.nn.sigmoid(lin(c, *params[8]))
    return encoded, decoded, label


if __name__ == "__main__":
    xn, yn = 16, 16          # inSize = 256 -> 128 -> 64 -> 32 bottleneck
    batch = 8

    key = jax.random.PRNGKey(0)
    k_params, k_x = jax.random.split(key)
    params = init_autoencoder_params(k_params, xn, yn)
    x = jax.random.uniform(k_x, (batch, xn * yn), jnp.float32)

    packed = pack_params(params)
    encoded, decoded, label = autoencoder_forward(x, packed)
    jax.block_until_ready((encoded, decoded, label))

    ref_enc, ref_dec, ref_lab = reference_forward(x, params)
    assert encoded.shape == (batch, (xn * yn) // 8)
    assert decoded.shape == (batch, xn * yn)
    assert label.shape == (batch, 16)
    assert jnp.allclose(encoded, ref_enc, atol=1e-3, rtol=1e-3)
    assert jnp.allclose(decoded, ref_dec, atol=1e-3, rtol=1e-3)
    assert jnp.allclose(label, ref_lab, atol=1e-3, rtol=1e-3)

    print("KERNEL_OK")
</pallas_src>

<mosaic_0001>
module attributes {stable_mosaic.version = 11 : i64} {
  func.func @autoencoder_kernel(%arg0: i32, %arg1: memref<8x256xf32, #tpu.memory_space<vmem>>, %arg2: memref<1024x128xbf16, #tpu.memory_space<vmem>>, %arg3: memref<128x256xbf16, #tpu.memory_space<vmem>>, %arg4: memref<8x256xf32, #tpu.memory_space<vmem>>, %arg5: memref<8x128xf32, #tpu.memory_space<vmem>>, %arg6: memref<8x256xf32, #tpu.memory_space<vmem>>, %arg7: memref<8x128xf32, #tpu.memory_space<vmem>>) attributes {dimension_semantics = [#tpu.dimension_semantics<parallel>], iteration_bounds = array<i64: 1>, scalar_prefetch = 0 : i64, scratch_operands = 0 : i64, tpu.core_type = #tpu.core_type<tc>, window_params = [{transform_indices = @transform_0, window_bounds = array<i64: 8, 256>}, {pipeline_mode = #tpu.pipeline_mode<synchronous>, transform_indices = @transform_1, window_bounds = array<i64: 1024, 128>}, {pipeline_mode = #tpu.pipeline_mode<synchronous>, transform_indices = @transform_2, window_bounds = array<i64: 128, 256>}, {pipeline_mode = #tpu.pipeline_mode<synchronous>, transform_indices = @transform_3, window_bounds = array<i64: 8, 256>}, {transform_indices = @transform_4, window_bounds = array<i64: 8, 128>}, {transform_indices = @transform_5, window_bounds = array<i64: 8, 256>}, {transform_indices = @transform_6, window_bounds = array<i64: 8, 128>}]} {
    %c0 = arith.constant 0 : index
    %c0_0 = arith.constant 0 : index
    %0 = vector.load %arg1[%c0, %c0_0] : memref<8x256xf32, #tpu.memory_space<vmem>>, vector<8x256xf32>
    %c0_1 = arith.constant 0 : index
    %c0_2 = arith.constant 0 : index
    %1 = vector.load %arg2[%c0_1, %c0_2] : memref<1024x128xbf16, #tpu.memory_space<vmem>>, vector<256x128xbf16>
    %2 = arith.truncf %0 : vector<8x256xf32> to vector<8x256xbf16>
    %cst = arith.constant dense<0.000000e+00> : vector<8x128xf32>
    %3 = tpu.matmul %2, %1, %cst {dimension_numbers = #tpu.dot_dimension_numbers<[1], [0], [0], [1], [0, 0, 1, 1], [], []>} : vector<8x256xbf16>, vector<256x128xbf16>, vector<8x128xf32> -> vector<8x128xf32>
    %c0_3 = arith.constant 0 : index
    %c0_4 = arith.constant 0 : index
    %4 = vector.load %arg4[%c0_3, %c0_4] : memref<8x256xf32, #tpu.memory_space<vmem>>, vector<1x128xf32>
    %5 = vector.broadcast %4 : vector<1x128xf32> to vector<8x128xf32>
    %6 = arith.addf %3, %5 : vector<8x128xf32>
    %7 = math.tanh %6 : vector<8x128xf32>
    %c256 = arith.constant 256 : index
    %c0_5 = arith.constant 0 : index
    %8 = vector.load %arg2[%c256, %c0_5] : memref<1024x128xbf16, #tpu.memory_space<vmem>>, vector<128x128xbf16>
    %9 = arith.truncf %7 : vector<8x128xf32> to vector<8x128xbf16>
    %cst_6 = arith.constant dense<0.000000e+00> : vector<8x128xf32>
    %10 = tpu.matmul %9, %8, %cst_6 {dimension_numbers = #tpu.dot_dimension_numbers<[1], [0], [0], [1], [0, 0, 1, 1], [], []>} : vector<8x128xbf16>, vector<128x128xbf16>, vector<8x128xf32> -> vector<8x128xf32>
    %c1 = arith.constant 1 : index
    %c0_7 = arith.constant 0 : index
    %11 = vector.load %arg4[%c1, %c0_7] : memref<8x256xf32, #tpu.memory_space<vmem>>, vector<1x128xf32>
    %12 = vector.broadcast %11 : vector<1x128xf32> to vector<8x128xf32>
    %13 = arith.addf %10, %12 : vector<8x128xf32>
    %14 = math.tanh %13 : vector<8x128xf32>
    %c384 = arith.constant 384 : index
    %c0_8 = arith.constant 0 : index
    %15 = vector.load %arg2[%c384, %c0_8] : memref<1024x128xbf16, #tpu.memory_space<vmem>>, vector<128x128xbf16>
    %16 = arith.truncf %14 : vector<8x128xf32> to vector<8x128xbf16>
    %cst_9 = arith.constant dense<0.000000e+00> : vector<8x128xf32>
    %17 = tpu.matmul %16, %15, %cst_9 {dimension_numbers = #tpu.dot_dimension_numbers<[1], [0], [0], [1], [0, 0, 1, 1], [], []>} : vector<8x128xbf16>, vector<128x128xbf16>, vector<8x128xf32> -> vector<8x128xf32>
    %c2 = arith.constant 2 : index
    %c0_10 = arith.constant 0 : index
    %18 = vector.load %arg4[%c2, %c0_10] : memref<8x256xf32, #tpu.memory_space<vmem>>, vector<1x128xf32>
    %19 = vector.broadcast %18 : vector<1x128xf32> to vector<8x128xf32>
    %20 = arith.addf %17, %19 : vector<8x128xf32>
    %c0_11 = arith.constant 0 : index
    %c0_12 = arith.constant 0 : index
    %21 = vector.load %arg5[%c0_11, %c0_12] : memref<8x128xf32, #tpu.memory_space<vmem>>, vector<8x128xf32>
    tpu.vector_store %arg5[%c0_11, %c0_12], %20 {strides = array<i32>} : memref<8x128xf32, #tpu.memory_space<vmem>>, vector<8x128xf32>,
    %c512 = arith.constant 512 : index
    %c0_13 = arith.constant 0 : index
    %22 = vector.load %arg2[%c512, %c0_13] : memref<1024x128xbf16, #tpu.memory_space<vmem>>, vector<128x128xbf16>
    %23 = arith.truncf %20 : vector<8x128xf32> to vector<8x128xbf16>
    %cst_14 = arith.constant dense<0.000000e+00> : vector<8x128xf32>
    %24 = tpu.matmul %23, %22, %cst_14 {dimension_numbers = #tpu.dot_dimension_numbers<[1], [0], [0], [1], [0, 0, 1, 1], [], []>} : vector<8x128xbf16>, vector<128x128xbf16>, vector<8x128xf32> -> vector<8x128xf32>
    %c3 = arith.constant 3 : index
    %c0_15 = arith.constant 0 : index
    %25 = vector.load %arg4[%c3, %c0_15] : memref<8x256xf32, #tpu.memory_space<vmem>>, vector<1x128xf32>
    %26 = vector.broadcast %25 : vector<1x128xf32> to vector<8x128xf32>
    %27 = arith.addf %24, %26 : vector<8x128xf32>
    %28 = math.tanh %27 : vector<8x128xf32>
    %c640 = arith.constant 640 : index
    %c0_16 = arith.constant 0 : index
    %29 = vector.load %arg2[%c640, %c0_16] : memref<1024x128xbf16, #tpu.memory_space<vmem>>, vector<128x128xbf16>
    %30 = arith.truncf %28 : vector<8x128xf32> to vector<8x128xbf16>
    %cst_17 = arith.constant dense<0.000000e+00> : vector<8x128xf32>
    %31 = tpu.matmul %30, %29, %cst_17 {dimension_numbers = #tpu.dot_dimension_numbers<[1], [0], [0], [1], [0, 0, 1, 1], [], []>} : vector<8x128xbf16>, vector<128x128xbf16>, vector<8x128xf32> -> vector<8x128xf32>
    %c4 = arith.constant 4 : index
    %c0_18 = arith.constant 0 : index
    %32 = vector.load %arg4[%c4, %c0_18] : memref<8x256xf32, #tpu.memory_space<vmem>>, vector<1x128xf32>
    %33 = vector.broadcast %32 : vector<1x128xf32> to vector<8x128xf32>
    %34 = arith.addf %31, %33 : vector<8x128xf32>
    %35 = math.tanh %34 : vector<8x128xf32>
    %36 = arith.truncf %35 : vector<8x128xf32> to vector<8x128xbf16>
    %c0_19 = arith.constant 0 : index
    %c0_20 = arith.constant 0 : index
    %37 = vector.load %arg3[%c0_19, %c0_20] : memref<128x256xbf16, #tpu.memory_space<vmem>>, vector<128x256xbf16>
    %cst_21 = arith.constant dense<0.000000e+00> : vector<8x256xf32>
    %38 = tpu.matmul %36, %37, %cst_21 {dimension_numbers = #tpu.dot_dimension_numbers<[1], [0], [0], [1], [0, 0, 1, 1], [], []>} : vector<8x128xbf16>, vector<128x256xbf16>, vector<8x256xf32> -> vector<8x256xf32>
    %c5 = arith.constant 5 : index
    %c0_22 = arith.constant 0 : index
    %39 = vector.load %arg4[%c5, %c0_22] : memref<8x256xf32, #tpu.memory_space<vmem>>, vector<1x256xf32>
    %40 = vector.broadcast %39 : vector<1x256xf32> to vector<8x256xf32>
    %41 = arith.addf %38, %40 : vector<8x256xf32>
    %42 = arith.negf %41 : vector<8x256xf32>
    %43 = math.exp %42 : vector<8x256xf32>
    %cst_23 = arith.constant 1.000000e+00 : f32
    %44 = vector.broadcast %cst_23 : f32 to vector<8x256xf32>
    %45 = arith.addf %44, %43 : vector<8x256xf32>
    %46 = arith.divf %44, %45 : vector<8x256xf32>
    %c0_24 = arith.constant 0 : index
    %c0_25 = arith.constant 0 : index
    %47 = vector.load %arg6[%c0_24, %c0_25] : memref<8x256xf32, #tpu.memory_space<vmem>>, vector<8x256xf32>
    tpu.vector_store %arg6[%c0_24, %c0_25], %46 {strides = array<i32>} : memref<8x256xf32, #tpu.memory_space<vmem>>, vector<8x256xf32>,
    %c768 = arith.constant 768 : index
    %c0_26 = arith.constant 0 : index
    %48 = vector.load %arg2[%c768, %c0_26] : memref<1024x128xbf16, #tpu.memory_space<vmem>>, vector<128x128xbf16>
    %49 = arith.truncf %28 : vector<8x128xf32> to vector<8x128xbf16>
    %cst_27 = arith.constant dense<0.000000e+00> : vector<8x128xf32>
    %50 = tpu.matmul %49, %48, %cst_27 {dimension_numbers = #tpu.dot_dimension_numbers<[1], [0], [0], [1], [0, 0, 1, 1], [], []>} : vector<8x128xbf16>, vector<128x128xbf16>, vector<8x128xf32> -> vector<8x128xf32>
    %c6 = arith.constant 6 : index
    %c0_28 = arith.constant 0 : index
    %51 = vector.load %arg4[%c6, %c0_28] : memref<8x256xf32, #tpu.memory_space<vmem>>, vector<1x128xf32>
    %52 = vector.broadcast %51 : vector<1x128xf32> to vector<8x128xf32>
    %53 = arith.addf %50, %52 : vector<8x128xf32>
    %54 = math.tanh %53 : vector<8x128xf32>
    %c896 = arith.constant 896 : index
    %c0_29 = arith.constant 0 : index
    %55 = vector.load %arg2[%c896, %c0_29] : memref<1024x128xbf16, #tpu.memory_space<vmem>>, vector<128x128xbf16>
    %56 = arith.truncf %54 : vector<8x128xf32> to vector<8x128xbf16>
    %cst_30 = arith.constant dense<0.000000e+00> : vector<8x128xf32>
    %57 = tpu.matmul %56, %55, %cst_30 {dimension_numbers = #tpu.dot_dimension_numbers<[1], [0], [0], [1], [0, 0, 1, 1], [], []>} : vector<8x128xbf16>, vector<128x128xbf16>, vector<8x128xf32> -> vector<8x128xf32>
    %c7 = arith.constant 7 : index
    %c0_31 = arith.constant 0 : index
    %58 = vector.load %arg4[%c7, %c0_31] : memref<8x256xf32, #tpu.memory_space<vmem>>, vector<1x128xf32>
    %59 = vector.broadcast %58 : vector<1x128xf32> to vector<8x128xf32>
    %60 = arith.addf %57, %59 : vector<8x128xf32>
    %61 = arith.negf %60 : vector<8x128xf32>
    %62 = math.exp %61 : vector<8x128xf32>
    %cst_32 = arith.constant 1.000000e+00 : f32
    %63 = vector.broadcast %cst_32 : f32 to vector<8x128xf32>
    %64 = arith.addf %63, %62 : vector<8x128xf32>
    %65 = arith.divf %63, %64 : vector<8x128xf32>
    %c0_33 = arith.constant 0 : index
    %c0_34 = arith.constant 0 : index
    %66 = vector.load %arg7[%c0_33, %c0_34] : memref<8x128xf32, #tpu.memory_space<vmem>>, vector<8x128xf32>
    tpu.vector_store %arg7[%c0_33, %c0_34], %65 {strides = array<i32>} : memref<8x128xf32, #tpu.memory_space<vmem>>, vector<8x128xf32>,
    return
  }
  func.func @transform_0(%arg0: i32) -> (i32, i32) {
    %c0_i32 = arith.constant 0 : i32
    %c0_i32_0 = arith.constant 0 : i32
    return %arg0, %c0_i32 : i32, i32
  }
  func.func @transform_1(%arg0: i32) -> (i32, i32) {
    %c0_i32 = arith.constant 0 : i32
    %c0_i32_0 = arith.constant 0 : i32
    %c0_i32_1 = arith.constant 0 : i32
    return %c0_i32, %c0_i32_0 : i32, i32
  }
  func.func @transform_2(%arg0: i32) -> (i32, i32) {
    %c0_i32 = arith.constant 0 : i32
    %c0_i32_0 = arith.constant 0 : i32
    %c0_i32_1 = arith.constant 0 : i32
    return %c0_i32, %c0_i32_0 : i32, i32
  }
  func.func @transform_3(%arg0: i32) -> (i32, i32) {
    %c0_i32 = arith.constant 0 : i32
    %c0_i32_0 = arith.constant 0 : i32
    %c0_i32_1 = arith.constant 0 : i32
    return %c0_i32, %c0_i32_0 : i32, i32
  }
  func.func @transform_4(%arg0: i32) -> (i32, i32) {
    %c0_i32 = arith.constant 0 : i32
    %c0_i32_0 = arith.constant 0 : i32
    return %arg0, %c0_i32 : i32, i32
  }
  func.func @transform_5(%arg0: i32) -> (i32, i32) {
    %c0_i32 = arith.constant 0 : i32
    %c0_i32_0 = arith.constant 0 : i32
    return %arg0, %c0_i32 : i32, i32
  }
  func.func @transform_6(%arg0: i32) -> (i32, i32) {
    %c0_i32 = arith.constant 0 : i32
    %c0_i32_0 = arith.constant 0 : i32
    return %arg0, %c0_i32 : i32, i32
  }
}

</mosaic_0001>

<bundles_post_ra>
// kernel: tpu_custom_call.1
= control target key start
LH: loop header
LB: loop body
LE: loop exit
PB: predicated region body
PF: predicated region fallthrough
CT: control target
= control target key end

     0   :  { %12 = vsyncpa [#allocation3], 0  ;;  %s1641_s0 = inlined_call_operand.hbm [shape: f32[8,256], index: 0, kind: input, shape index: {}]   ;;  %s1642_s1 = inlined_call_operand.hbm [shape: bf16[1024,128], index: 1, kind: input, shape index: {}]   ;;  %s1643_s2 = inlined_call_operand.hbm [shape: bf16[128,256], index: 2, kind: input, shape index: {}]   ;;  %s1644_s3 = inlined_call_operand.hbm [shape: f32[8,256], index: 3, kind: input, shape index: {}]   ;;  %s1645_s4 = inlined_call_operand.hbm [shape: f32[8,128], index: 4, kind: output, shape index: {0}]   ;;  %s1646_s5 = inlined_call_operand.hbm [shape: f32[8,256], index: 5, kind: output, shape index: {1}]   ;;  %s1647_s6 = inlined_call_operand.hbm [shape: f32[8,128], index: 6, kind: output, shape index: {2}]  }
   0x1   :  { %13 = vsyncpa [#allocation6], 0 }
   0x2   :  { %14 = vsyncpa [#allocation9], 0 }
   0x3   :  { %15 = vsyncpa [#allocation4], 0  ;;  %s32_s23 = sshll.u32 %s1642_s1, 4  ;;  %s33_s23 = int_to_ptr.hbm [resolvable:$true] %s32_s23 }
   0x4   :  { %16 = vsyncpa [#allocation12], 0  ;;  %s1573_s24 = smov [#allocation5]   ;;  %s22_s28 = sshll.u32 %s1641_s0, 4  ;;  %s23_s28 = int_to_ptr.hbm [resolvable:$true] %s22_s28 }
   0x5   :  { %s34_s25 = sshll.u32 %s1573_s24, 4  ;;  %s1574_s29 = smov 64   ;;  %s35_s25 = int_to_ptr.vmem [resolvable:$true] %s34_s25 }
   0x6   :  { %s1575_s30 = smov 4   ;;  %s1576_s7 = smov [#allocation2]  }
   0x7   :  { %40 = dma.hbm_to_vmem [thread:$0]  %s33_s23, 8192, %s35_s25, [#allocation6], %s1574_s29, %s1574_s29, %s1575_s30  }
   0x8   :  { %s24_s8 = sshll.u32 %s1576_s7, 4  ;;  %s45_s11 = sshll.u32 %s1643_s2, 4  ;;  %s25_s8 = int_to_ptr.vmem [resolvable:$true] %s24_s8  ;;  %s46_s11 = int_to_ptr.hbm [resolvable:$true] %s45_s11 }
   0x9   :  { %27 = dma.hbm_to_vmem [thread:$0]  %s23_s28, 256, %s25_s8, [#allocation3]  }
   0xa   :  { %s1577_s1 = smov [#allocation7]   ;;  %s59_s0 = sshll.u32 %s1644_s3, 4  ;;  %s60_s0 = int_to_ptr.hbm [resolvable:$true] %s59_s0 }
   0xb   :  { %s47_s12 = sshll.u32 %s1577_s1, 4  ;;  %s1578_s15 = smov 128   ;;  %s48_s12 = int_to_ptr.vmem [resolvable:$true] %s47_s12 }
   0xc   :  { %s1579_s16 = smov 8   ;;  %s1580_s17 = smov [#allocation8]  }
   0xd   :  { %53 = dma.hbm_to_vmem [thread:$0]  %s46_s11, 2048, %s48_s12, [#allocation6], %s1578_s15, %s1578_s15, %s1579_s16  }
   0xe   :  { %s61_s18 = sshll.u32 %s1580_s17, 4  ;;  %s62_s18 = int_to_ptr.vmem [resolvable:$true] %s61_s18 }
   0xf   :  { %64 = dma.hbm_to_vmem [thread:$0]  %s60_s0, 256, %s62_s18, [#allocation9]  }
  0x10   :  { %1563 = dma.done.wait [#allocation3], 256  }
  0x11   :  { %1564 = vsyncadd [#allocation3], 4294967040 }
  0x12   :  { %1565 = dma.done.wait [#allocation6], 10240  }
  0x13   :  { %1566 = vsyncadd [#allocation6], 4294957056 }
  0x14   :  { %1567 = dma.done.wait [#allocation9], 256  }
  0x15   :  { %1568 = vsyncadd [#allocation9], 4294967040  ;;  %v1289_v0 = vld [vmem:[#allocation5 + $0x38] sm:$0xff]  ;;  %v1288_v2 = vld [vmem:[#allocation5 + $0x30] sm:$0xff]  ;;  %s916_s19 = sshll.u32 %s1645_s4, 4  ;;  %s1581_s20 = smov [#allocation10]   ;;  %s917_s19 = int_to_ptr.hbm [resolvable:$true] %s916_s19 }
  0x16   :  { %v1297_v1 = vld [vmem:[#allocation5 + $0x78] sm:$0xff]  ;;  %214 = vmatpush.bf16.msra.mxu0 %v1289_v0  ;;  %v1296_v3 = vld [vmem:[#allocation5 + $0x70] sm:$0xff]  ;;  %v1287_v4 = vld [vmem:[#allocation5 + $0x28] sm:$0xff]  ;;  %s914_s21 = sshll.u32 %s1581_s20, 4  ;;  %s1582_s4 = smov [#allocation11]   ;;  %s915_s21 = int_to_ptr.vmem [resolvable:$true] %s914_s21 }
  0x17   :  { %227 = vmatpush.bf16.msra.mxu1 %v1297_v1  ;;  %v1295_v5 = vld [vmem:[#allocation5 + $0x68] sm:$0xff]  ;;  %v1305_v6 = vld [vmem:[#allocation5 + $0xb8] sm:$0xff]  ;;  %v1304_v7 = vld [vmem:[#allocation5 + $0xb0] sm:$0xff]  ;;  %s925_s22 = sshll.u32 %s1582_s4, 4  ;;  %s927_s25 = sshll.u32 %s1646_s5, 4  ;;  %s926_s22 = int_to_ptr.vmem [resolvable:$true] %s925_s22  ;;  %s928_s25 = int_to_ptr.hbm [resolvable:$true] %s927_s25 }
  0x18   :  { %307 = vmatpush.bf16.msra.mxu2 %v1305_v6  ;;  %v1286_v8 = vld [vmem:[#allocation5 + $0x20] sm:$0xff]  ;;  %v1303_v10 = vld [vmem:[#allocation5 + $0xa8] sm:$0xff]  ;;  %v1285_v11 = vld [vmem:[#allocation5 + $0x18] sm:$0xff]  ;;  %s1583_s26 = smov [#allocation13]   ;;  %s938_s30 = sshll.u32 %s1647_s6, 4  ;;  %s939_s30 = int_to_ptr.hbm [resolvable:$true] %s938_s30 }
  0x19   :  { %v1294_v9 = vld [vmem:[#allocation5 + $0x60] sm:$0xff]  ;;  %v1293_v12 = vld [vmem:[#allocation5 + $0x58] sm:$0xff]  ;;  %v1284_v14 = vld [vmem:[#allocation5 + $0x10] sm:$0xff]  ;;  %s936_s27 = sshll.u32 %s1583_s26, 4  ;;  %s937_s27 = int_to_ptr.vmem [resolvable:$true] %s936_s27 }
  0x1a   :  { %215 = vmatpush.bf16.msra.mxu0 %v1288_v2  ;;  %v1302_v13 = vld [vmem:[#allocation5 + $0xa0] sm:$0xff]  ;;  %v1292_v15 = vld [vmem:[#allocation5 + $0x50] sm:$0xff]  ;;  %v1301_v16 = vld [vmem:[#allocation5 + $0x98] sm:$0xff] }
  0x1b   :  { %228 = vmatpush.bf16.msra.mxu1 %v1296_v3  ;;  %v1283_v17 = vld [vmem:[#allocation5 + $0x8] sm:$0xff]  ;;  %v1282_v19 = vld [vmem:[#allocation5] sm:$0xff]  ;;  %v81_v21 = vld [vmem:[#allocation2] sm:$0xff] }
  0x1c   :  { %308 = vmatpush.bf16.msra.mxu2 %v1304_v7  ;;  %v1291_v18 = vld [vmem:[#allocation5 + $0x48] sm:$0xff]  ;;  %v1290_v20 = vld [vmem:[#allocation5 + $0x40] sm:$0xff]  ;;  %v82_v22 = vld [vmem:[#allocation2 + $0x8] sm:$0xff]  ;;  %v115_v23 = vpack.c.bf16 %v81_v21, %v81_v21 }
  0x1d   :  { %v116_v24 = vpack.c.bf16 %v82_v22, %v82_v22  ;;  %v1300_v25 = vld [vmem:[#allocation5 + $0x90] sm:$0xff]  ;;  %v1299_v26 = vld [vmem:[#allocation5 + $0x88] sm:$0xff]  ;;  %v1298_v27 = vld [vmem:[#allocation5 + $0x80] sm:$0xff] }
  0x1e   :  { %216 = vmatpush.bf16.msra.mxu0 %v1287_v4  ;;  %v1313_v28 = vld [vmem:[#allocation5 + $0xf8] sm:$0xff]  ;;  %v1312_v29 = vld [vmem:[#allocation5 + $0xf0] sm:$0xff]  ;;  %v1311_v30 = vld [vmem:[#allocation5 + $0xe8] sm:$0xff] }
  0x1f   :  { %229 = vmatpush.bf16.msra.mxu1 %v1295_v5  ;;  %387 = vmatpush.bf16.msra.mxu3 %v1313_v28  ;;  %v1310_v31 = vld [vmem:[#allocation5 + $0xe0] sm:$0xff]  ;;  %v1309_v32 = vld [vmem:[#allocation5 + $0xd8] sm:$0xff]  ;;  %v1308_v42 = vld [vmem:[#allocation5 + $0xd0] sm:$0xff] }
  0x20   :  { %309 = vmatpush.bf16.msra.mxu2 %v1303_v10  ;;  %v117_v33 = vld [vmem:[#allocation8] ss:$0 sm:$0xff]  ;;  %v1307_v43 = vld [vmem:[#allocation5 + $0xc8] sm:$0xff]  ;;  %v1321_v45 = vld [vmem:[#allocation5 + $0x138] sm:$0xff] }
  0x21   :  { %v1306_v44 = vld [vmem:[#allocation5 + $0xc0] sm:$0xff]  ;;  %v1320_v46 = vld [vmem:[#allocation5 + $0x130] sm:$0xff]  ;;  %v1319_v47 = vld [vmem:[#allocation5 + $0x128] sm:$0xff] }
  0x22   :  { %217 = vmatpush.bf16.msra.mxu0 %v1286_v8  ;;  %v1318_v48 = vld [vmem:[#allocation5 + $0x120] sm:$0xff]  ;;  %v1317_v49 = vld [vmem:[#allocation5 + $0x118] sm:$0xff]  ;;  %v1316_v51 = vld [vmem:[#allocation5 + $0x110] sm:$0xff] }
  0x23   :  { %230 = vmatpush.bf16.msra.mxu1 %v1294_v9  ;;  %388 = vmatpush.bf16.msra.mxu3 %v1312_v29  ;;  %v258_v50 = vld [vmem:[#allocation8 + $0x1] ss:$0 sm:$0xff]  ;;  %v1315_v54 = vld [vmem:[#allocation5 + $0x108] sm:$0xff]  ;;  %v1329_v59 = vld [vmem:[#allocation5 + $0x178] sm:$0xff] }
  0x24   :  { %310 = vmatpush.bf16.msra.mxu2 %v1302_v13  ;;  %v1314_v58 = vld [vmem:[#allocation5 + $0x100] sm:$0xff]  ;;  %v1353_v60 = vld [vmem:[#allocation5 + $0x1b8] sm:$0xff]  ;;  %v1328_v61 = vld [vmem:[#allocation5 + $0x170] sm:$0xff] }
  0x25   :  { %v1352_v62 = vld [vmem:[#allocation5 + $0x1b0] sm:$0xff]  ;;  %v1327_v63 = vld [vmem:[#allocation5 + $0x168] sm:$0xff]  ;;  %v1326_v1 = vld [vmem:[#allocation5 + $0x160] sm:$0xff] }
  0x26   :  { %218 = vmatpush.bf16.msra.mxu0 %v1285_v11  ;;  %v1351_v0 = vld [vmem:[#allocation5 + $0x1a8] sm:$0xff]  ;;  %v1350_v2 = vld [vmem:[#allocation5 + $0x1a0] sm:$0xff]  ;;  %v1325_v3 = vld [vmem:[#allocation5 + $0x158] sm:$0xff] }
  0x27   :  { %231 = vmatpush.bf16.msra.mxu1 %v1293_v12  ;;  %389 = vmatpush.bf16.msra.mxu3 %v1311_v30  ;;  %v1349_v4 = vld [vmem:[#allocation5 + $0x198] sm:$0xff]  ;;  %v338_v5 = vld [vmem:[#allocation8 + $0x2] ss:$0 sm:$0xff]  ;;  %v1324_v10 = vld [vmem:[#allocation5 + $0x150] sm:$0xff] }
  0x28   :  { %311 = vmatpush.bf16.msra.mxu2 %v1301_v16  ;;  %v1348_v11 = vld [vmem:[#allocation5 + $0x190] sm:$0xff]  ;;  %v1323_v12 = vld [vmem:[#allocation5 + $0x148] sm:$0xff]  ;;  %v1361_v21 = vld [vmem:[#allocation5 + $0x1f8] sm:$0xff] }
  0x29   :  { %v1347_v13 = vld [vmem:[#allocation5 + $0x188] sm:$0xff]  ;;  %v1209_v16 = vld [vmem:[#allocation7 + $0x70] sm:$0xf]  ;;  %v1201_v22 = vld [vmem:[#allocation7 + $0x60] sm:$0xf] }
  0x2a   :  { %219 = vmatpush.bf16.msra.mxu0 %v1284_v14  ;;  %v1322_v14 = vld [vmem:[#allocation5 + $0x140] sm:$0xff]  ;;  %v1360_v28 = vld [vmem:[#allocation5 + $0x1f0] sm:$0xff] }
  0x2b   :  { %232 = vmatpush.bf16.msra.mxu1 %v1292_v15  ;;  %390 = vmatpush.bf16.msra.mxu3 %v1310_v31  ;;  %v1346_v15 = vld [vmem:[#allocation5 + $0x180] sm:$0xff]  ;;  %v1193_v30 = vld [vmem:[#allocation7 + $0x50] sm:$0xf]  ;;  %v1341_v31 = vld [vmem:[#allocation7 + $0x54] sm:$0xf0] }
  0x2c   :  { %312 = vmatpush.bf16.msra.mxu2 %v1300_v25  ;;  %v1342_v25 = vld [vmem:[#allocation7 + $0x64] sm:$0xf] }
  0x2e   :  { %220 = vmatpush.bf16.msra.mxu0 %v1283_v17  ;;  %v1345_v17 = vld [vmem:[#allocation7 + $0x74] sm:$0xf0] }
  0x2f   :  { %233 = vmatpush.bf16.msra.mxu1 %v1291_v18  ;;  %391 = vmatpush.bf16.msra.mxu3 %v1309_v32  ;;  %v1344_v18 = vld [vmem:[#allocation7 + $0x74] sm:$0xf] }
  0x30   :  { %313 = vmatpush.bf16.msra.mxu2 %v1299_v26  ;;  %v1203_v26 = vld [vmem:[#allocation7 + $0x68] sm:$0xf0]  ;;  %v1340_v32 = vld [vmem:[#allocation7 + $0x54] sm:$0xf] }
  0x31   :  { %v1206_v29 = vor.u32 %v1342_v25, %v1203_v26  ;;  %v827_v26 = vld [vmem:[#allocation8 + $0x7] ss:$0 sm:$0xff] }
  0x32   :  { %221 = vmatpush.bf16.msra.mxu0 %v1282_v19  ;;  %v1210_v19 = vor.u32 %v1345_v17, %v1209_v16 }
  0x33   :  { %234 = vmatpush.bf16.msra.mxu1 %v1290_v20  ;;  %392 = vmatpush.bf16.msra.mxu3 %v1308_v42  ;;  %v1211_v20 = vld [vmem:[#allocation7 + $0x78] sm:$0xf0]  ;;  %v1358_v42 = vld [vmem:[#allocation5 + $0x1e0] sm:$0xff] }
  0x34   :  { %314 = vmatpush.bf16.msra.mxu2 %v1298_v27 }
  0x35   :  { %222 = vmatmul.bf16.vlgmr.msra.gmra.mxu0 %v115_v23  ;;  %v1214_v23 = vor.u32 %v1344_v18, %v1211_v20 }
  0x36   :  { %235 = vmatmul.bf16.vlgmr.msra.gmra.mxu1 %v116_v24  ;;  %467 = vmatpush.bf16.msrb.mxu0 %v1321_v45  ;;  %v1343_v24 = vld [vmem:[#allocation7 + $0x64] sm:$0xf0]  ;;  %v1337_v45 = vld [vmem:[#allocation7 + $0x34] sm:$0xf0] }
  0x37   :  { %393 = vmatpush.bf16.msra.mxu3 %v1307_v43  ;;  %547 = vmatpush.bf16.msrb.mxu1 %v1329_v59  ;;  %v1202_v27 = vor.u32 %v1343_v24, %v1201_v22  ;;  %v1334_v59 = vld [vmem:[#allocation7 + $0x24] sm:$0xf] }
  0x38   :  { %665 = vmatpush.bf16.msrb.mxu2 %v1210_v19 }
  0x3a   :  { %468 = vmatpush.bf16.msrb.mxu0 %v1320_v46  ;;  %v1336_v46 = vld [vmem:[#allocation7 + $0x34] sm:$0xf] }
  0x3b   :  { %394 = vmatpush.bf16.msra.mxu3 %v1306_v44  ;;  %548 = vmatpush.bf16.msrb.mxu1 %v1328_v61  ;;  %v1177_v44 = vld [vmem:[#allocation7 + $0x30] sm:$0xf]  ;;  %v1171_v61 = vld [vmem:[#allocation7 + $0x28] sm:$0xf0] }
  0x3c   :  { %666 = vmatpush.bf16.msrb.mxu2 %v1202_v27  ;;  %v579_v27 = vld [vmem:[#allocation8 + $0x5] ss:$8 sm:$0x3] }
  0x3e   :  { %469 = vmatpush.bf16.msrb.mxu0 %v1319_v47  ;;  %v1179_v47 = vld [vmem:[#allocation7 + $0x38] sm:$0xf0] }
  0x3f   :  { %549 = vmatpush.bf16.msrb.mxu1 %v1327_v63  ;;  %678 = vmatpush.bf16.msrb.mxu3 %v1214_v23  ;;  %v1174_v63 = vor.u32 %v1334_v59, %v1171_v61 }
  0x42   :  { %470 = vmatpush.bf16.msrb.mxu0 %v1318_v48  ;;  %v1178_v48 = vor.u32 %v1337_v45, %v1177_v44 }
  0x43   :  { %550 = vmatpush.bf16.msrb.mxu1 %v1326_v1  ;;  %679 = vmatpush.bf16.msrb.mxu3 %v1206_v29  ;;  %v1333_v1 = vld [vmem:[#allocation7 + $0x14] sm:$0xf0] }
  0x46   :  { %471 = vmatpush.bf16.msrb.mxu0 %v1317_v49  ;;  %v1357_v49 = vld [vmem:[#allocation5 + $0x1d8] sm:$0xff] }
  0x47   :  { %551 = vmatpush.bf16.msrb.mxu1 %v1325_v3 }
  0x4a   :  { %472 = vmatpush.bf16.msrb.mxu0 %v1316_v51  ;;  %v418_v51 = vld [vmem:[#allocation8 + $0x3] ss:$0 sm:$0xff] }
  0x4b   :  { %552 = vmatpush.bf16.msrb.mxu1 %v1324_v10 }
  0x4e   :  { %473 = vmatpush.bf16.msrb.mxu0 %v1315_v54 }
  0x4f   :  { %553 = vmatpush.bf16.msrb.mxu1 %v1323_v12  ;;  %v1354_v12 = vld [vmem:[#allocation5 + $0x1c0] sm:$0xff] }
  0x52   :  { %474 = vmatpush.bf16.msrb.mxu0 %v1314_v58  ;;  %v1335_v58 = vld [vmem:[#allocation7 + $0x24] sm:$0xf0] }
  0x53   :  { %554 = vmatpush.bf16.msrb.mxu1 %v1322_v14  ;;  %v498_v14 = vld [vmem:[#allocation8 + $0x4] ss:$0 sm:$0xff] }
  0x56   :  { %796 = vmatpush.bf16.msra.mxu0 %v1353_v60 }
  0x57   :  { %876 = vmatpush.bf16.msra.mxu1 %v1361_v21 }
  0x5a   :  { %797 = vmatpush.bf16.msra.mxu0 %v1352_v62  ;;  %v1356_v62 = vld [vmem:[#allocation5 + $0x1d0] sm:$0xff] }
  0x5b   :  { %877 = vmatpush.bf16.msra.mxu1 %v1360_v28 }
  0x5e   :  { %798 = vmatpush.bf16.msra.mxu0 %v1351_v0  ;;  %v1161_v0 = vld [vmem:[#allocation7 + $0x10] sm:$0xf] }
  0x5f   :  { %v1162_v3 = vor.u32 %v1333_v1, %v1161_v0 }
  0x62   :  { %799 = vmatpush.bf16.msra.mxu0 %v1350_v2  ;;  %v1332_v2 = vld [vmem:[#allocation7 + $0x14] sm:$0xf] }
  0x66   :  { %800 = vmatpush.bf16.msra.mxu0 %v1349_v4  ;;  %v1163_v4 = vld [vmem:[#allocation7 + $0x18] sm:$0xf0] }
  0x6a   :  { %801 = vmatpush.bf16.msra.mxu0 %v1348_v11  ;;  %v1155_v11 = vld [vmem:[#allocation7 + $0x8] sm:$0xf0] }
  0x6e   :  { %802 = vmatpush.bf16.msra.mxu0 %v1347_v13 }
  0x72   :  { %803 = vmatpush.bf16.msra.mxu0 %v1346_v15  ;;  %v747_v15 = vld [vmem:[#allocation8 + $0x6] ss:$0 sm:$0xff] }
  0xb2   :  { %v223_v34 = vpop.f32.mrf.mxu0 }
  0xb3   :  { %v236_v35 = vpop.f32.mrf.mxu1  ;;  %v224_v36 = vadd.f32 %v223_v34, %v117_v33  ;;  %v1195_v33 = vld [vmem:[#allocation7 + $0x58] sm:$0xf0]  ;;  %v1194_v34 = vor.u32 %v1341_v31, %v1193_v30  ;;  %v581_v30 = vperm.slane %v579_v27, 0  ;;  %v582_v31 = vperm.slane %v579_v27, 1 }
  0xb5   :  { %v237_v37 = vadd.f32 %v236_v35, %v224_v36  ;;  %v1359_v35 = vld [vmem:[#allocation5 + $0x1e8] sm:$0xff]  ;;  %v1198_v36 = vor.u32 %v1340_v32, %v1195_v33  ;;  %667 = vmatpush.bf16.msrb.mxu2 %v1194_v34 }
  0xb6   :  { %878 = vmatpush.bf16.msra.mxu1 %v1359_v35 }
  0xb7   :  { %1373 = vtanh.f32 %v237_v37  ;;  %v1185_v37 = vld [vmem:[#allocation7 + $0x40] sm:$0xf]  ;;  %680 = vmatpush.bf16.msrb.mxu3 %v1198_v36 }
  0xba   :  { %v225_v38 = vpop.f32.mrf.mxu0  ;;  %879 = vmatpush.bf16.msra.mxu1 %v1358_v42 }
  0xbb   :  { %v238_v39 = vpop.f32.mrf.mxu1  ;;  %v1339_v38 = vld [vmem:[#allocation7 + $0x44] sm:$0xf0] }
  0xbc   :  { %v1338_v39 = vld [vmem:[#allocation7 + $0x44] sm:$0xf] }
  0xbd   :  { %v1374_v40 = vpop.eup %1373 }
  0xbe   :  { %v257_v41 = vpack.c.bf16 %v1374_v40, %v1374_v40  ;;  %v1187_v40 = vld [vmem:[#allocation7 + $0x48] sm:$0xf0]  ;;  %880 = vmatpush.bf16.msra.mxu1 %v1357_v49 }
  0xbf   :  { %v1190_v43 = vor.u32 %v1338_v39, %v1187_v40 }
  0xc0   :  { %315 = vmatmul.bf16.vlgmr.msra.gmra.mxu2 %v257_v41  ;;  %v1186_v41 = vor.u32 %v1339_v38, %v1185_v37 }
  0xc1   :  { %681 = vmatpush.bf16.msrb.mxu3 %v1190_v43 }
  0xc2   :  { %668 = vmatpush.bf16.msrb.mxu2 %v1186_v41  ;;  %881 = vmatpush.bf16.msra.mxu1 %v1356_v62 }
  0xc6   :  { %669 = vmatpush.bf16.msrb.mxu2 %v1178_v48 }
 0x143   :  { %v316_v52 = vpop.f32.mrf.mxu2 }
 0x144   :  { %v317_v53 = vadd.f32 %v316_v52, %v258_v50  ;;  %v1182_v50 = vor.u32 %v1336_v46, %v1179_v47 }
 0x146   :  { %1375 = vtanh.f32 %v317_v53  ;;  %682 = vmatpush.bf16.msrb.mxu3 %v1182_v50 }
 0x14a   :  { %683 = vmatpush.bf16.msrb.mxu3 %v1174_v63 }
 0x14b   :  { %v318_v55 = vpop.f32.mrf.mxu2 }
 0x14c   :  { %v1376_v56 = vpop.eup %1375 }
 0x14d   :  { %v337_v57 = vpack.c.bf16 %v1376_v56, %v1376_v56 }
 0x14f   :  { %395 = vmatmul.bf16.vlgmr.msra.gmra.mxu3 %v337_v57  ;;  %v1169_v57 = vld [vmem:[#allocation7 + $0x20] sm:$0xf] }
 0x150   :  { %v1170_v60 = vor.u32 %v1335_v58, %v1169_v57 }
 0x152   :  { %670 = vmatpush.bf16.msrb.mxu2 %v1170_v60 }
 0x156   :  { %671 = vmatpush.bf16.msrb.mxu2 %v1162_v3 }
 0x1d2   :  { %v396_v6 = vpop.f32.mrf.mxu3 }
 0x1d3   :  { %v397_v7 = vadd.f32 %v396_v6, %v338_v5  ;;  %v1355_v5 = vld [vmem:[#allocation5 + $0x1c8] sm:$0xff]  ;;  %v1166_v6 = vor.u32 %v1332_v2, %v1163_v4 }
 0x1d4   :  { %882 = vmatpush.bf16.msra.mxu1 %v1355_v5 }
 0x1d5   :  { %400 = vst [vmem:[#allocation10] sm:$0xff] %v397_v7  ;;  %v417_v8 = vpack.c.bf16 %v397_v7, %v397_v7  ;;  %684 = vmatpush.bf16.msrb.mxu3 %v1166_v6  ;;  %v1153_v7 = vld [vmem:[#allocation7] sm:$0xf] }
 0x1d6   :  { %919 = dma.vmem_to_hbm [thread:$0]  %s915_s21, 128, %s917_s19, [#allocation4]  }
 0x1d7   :  { %475 = vmatmul.bf16.vlgmr.msrb.gmra.mxu0 %v417_v8  ;;  %v1331_v8 = vld [vmem:[#allocation7 + $0x4] sm:$0xf0] }
 0x1d8   :  { %v1154_v10 = vor.u32 %v1331_v8, %v1153_v7  ;;  %883 = vmatpush.bf16.msra.mxu1 %v1354_v12 }
 0x1da   :  { %v398_v9 = vpop.f32.mrf.mxu3  ;;  %672 = vmatpush.bf16.msrb.mxu2 %v1154_v10 }
 0x1db   :  { %v1330_v9 = vld [vmem:[#allocation7 + $0x4] sm:$0xf] }
 0x1dc   :  { %v1158_v13 = vor.u32 %v1330_v9, %v1155_v11 }
 0x1de   :  { %685 = vmatpush.bf16.msrb.mxu3 %v1158_v13 }
 0x254   :  { %v476_v52 = vpop.f32.mrf.mxu0 }
 0x255   :  { %v477_v53 = vadd.f32 %v476_v52, %v418_v51 }
 0x257   :  { %1377 = vtanh.f32 %v477_v53 }
 0x25c   :  { %v478_v54 = vpop.f32.mrf.mxu0 }
 0x25d   :  { %v1378_v55 = vpop.eup %1377 }
 0x25e   :  { %v497_v56 = vpack.c.bf16 %v1378_v55, %v1378_v55 }
 0x260   :  { %555 = vmatmul.bf16.vlgmr.msrb.gmra.mxu1 %v497_v56  ;;  %804 = vmatmul.bf16.vlgmr.msra.gmra.mxu0 %v497_v56 }
 0x2dd   :  { %v556_v16 = vpop.f32.mrf.mxu1  ;;  %v805_v17 = vpop.f32.mrf.mxu0 }
 0x2de   :  { %v557_v18 = vadd.f32 %v556_v16, %v498_v14  ;;  %v806_v19 = vadd.f32 %v805_v17, %v747_v15 }
 0x2e0   :  { %1379 = vtanh.f32 %v557_v18 }
 0x2e1   :  { %1381 = vtanh.f32 %v806_v19 }
 0x2e5   :  { %v558_v20 = vpop.f32.mrf.mxu1  ;;  %v807_v21 = vpop.f32.mrf.mxu0 }
 0x2e6   :  { %v1380_v22 = vpop.eup %1379 }
 0x2e7   :  { %v1382_v23 = vpop.eup %1381  ;;  %v561_v24 = vpack.c.bf16 %v1380_v22, %v1380_v22 }
 0x2e8   :  { %v826_v25 = vpack.c.bf16 %v1382_v23, %v1382_v23 }
 0x2e9   :  { %673 = vmatmul.bf16.vlgmr.msrb.gmra.mxu2 %v561_v24  ;;  %686 = vmatmul.bf16.vlgmr.msrb.gmra.mxu3 %v561_v24 }
 0x2ea   :  { %884 = vmatmul.bf16.vlgmr.msra.gmra.mxu1 %v826_v25 }
 0x367   :  { %v885_v28 = vpop.f32.mrf.mxu1 }
 0x368   :  { %v886_v29 = vadd.f32 %v885_v28, %v827_v26 }
 0x36a   :  { %v1281_v32 = vmul.f32 -1.442695, %v886_v29 }
 0x36c   :  { %1383 = vpow2.f32 %v1281_v32  ;;  %v674_v33 = vpop.f32.mrf.mxu2  ;;  %v687_v34 = vpop.f32.mrf.mxu3 }
 0x36d   :  { %v675_v35 = vadd.f32 %v674_v33, %v581_v30  ;;  %v688_v36 = vadd.f32 %v687_v34, %v582_v31 }
 0x36f   :  { %v1215_v37 = vmul.f32 -1.442695, %v675_v35  ;;  %v1216_v38 = vmul.f32 -1.442695, %v688_v36  ;;  %v887_v39 = vpop.f32.mrf.mxu1 }
 0x371   :  { %1385 = vpow2.f32 %v1215_v37 }
 0x372   :  { %v1384_v40 = vpop.eup %1383  ;;  %1387 = vpow2.f32 %v1216_v38 }
 0x373   :  { %v892_v41 = vadd.f32 1.0, %v1384_v40 }
 0x374   :  { %v676_v42 = vpop.f32.mrf.mxu2  ;;  %v689_v43 = vpop.f32.mrf.mxu3 }
 0x375   :  { %1389 = vrcp.f32 %v892_v41  ;;  %v902_v51 = vand.u32 2147483647, %v892_v41  ;;  %v904_v52 = vand.u32 2147483648, %v892_v41  ;;  %vm898_vm1 = vweird.f32 %v892_v41 }
 0x377   :  { %v1386_v44 = vpop.eup %1385  ;;  %vm903_vm3 = vcmp.eq.f32.partialorder %v902_v51, 8.507059e+37  ;;  %v905_v60 = vor.u32 1.1754944e-38, %v904_v52 }
 0x378   :  { %v1388_v45 = vpop.eup %1387  ;;  %v697_v46 = vadd.f32 1.0, %v1386_v44 }
 0x379   :  { %v698_v47 = vadd.f32 1.0, %v1388_v45 }
 0x37a   :  { %1391 = vrcp.f32 %v697_v46  ;;  %v708_v62 = vand.u32 2147483647, %v697_v46  ;;  %v710_v63 = vand.u32 2147483648, %v697_v46  ;;  %vm704_vm6 = vweird.f32 %v697_v46 }
 0x37b   :  { %v1390_v48 = vpop.eup %1389  ;;  %1393 = vrcp.f32 %v698_v47  ;;  %v725_v2 = vand.u32 2147483648, %v698_v47  ;;  %v723_v5 = vand.u32 2147483647, %v698_v47  ;;  %vm719_vm8 = vweird.f32 %v698_v47 }
 0x37c   :  { %v894_v49 = vmul.f32 %v1390_v48, %v892_v41  ;;  %vm899_vm0 = vweird.f32 %v1390_v48  ;;  %v711_v7 = vor.u32 1.1754944e-38, %v710_v63  ;;  %vm709_vm9 = vcmp.eq.f32.partialorder %v708_v62, 8.507059e+37 }
 0x37d   :  { %vm900_vm2 = vmor %vm898_vm1, %vm899_vm0  ;;  %v726_v10 = vor.u32 1.1754944e-38, %v725_v2  ;;  %vm724_vm11 = vcmp.eq.f32.partialorder %v723_v5, 8.507059e+37 }
 0x37e   :  { %v895_v50 = vsub.f32 1.0, %v894_v49 }
 0x380   :  { %v1392_v53 = vpop.eup %1391  ;;  %v896_v54 = vmul.f32 %v1390_v48, %v895_v50 }
 0x381   :  { %v1394_v55 = vpop.eup %1393  ;;  %v700_v56 = vmul.f32 %v1392_v53, %v697_v46  ;;  %vm705_vm4 = vweird.f32 %v1392_v53 }
 0x382   :  { %v715_v57 = vmul.f32 %v1394_v55, %v698_v47  ;;  %v897_v58 = vadd.f32 %v1390_v48, %v896_v54  ;;  %vm720_vm5 = vweird.f32 %v1394_v55  ;;  %vm706_vm7 = vmor %vm704_vm6, %vm705_vm4 }
 0x383   :  { %v701_v59 = vsub.f32 1.0, %v700_v56  ;;  %vm721_vm10 = vmor %vm719_vm8, %vm720_vm5 }
 0x384   :  { %v716_v61 = vsub.f32 1.0, %v715_v57  ;;  %v901_v0 = vsel %vm900_vm2, %v1390_v48, %v897_v58 }
 0x385   :  { %v702_v1 = vmul.f32 %v1392_v53, %v701_v59  ;;  %v906_v3 = vsel %vm903_vm3, %v905_v60, %v901_v0 }
 0x386   :  { %v717_v4 = vmul.f32 %v1394_v55, %v716_v61  ;;  %908 = vst [vmem:[#allocation13] sm:$0xff] %v906_v3 }
 0x387   :  { %v703_v6 = vadd.f32 %v1392_v53, %v702_v1 }
 0x388   :  { %v718_v8 = vadd.f32 %v1394_v55, %v717_v4 }
 0x389   :  { %v707_v9 = vsel %vm706_vm7, %v1392_v53, %v703_v6 }
 0x38a   :  { %v712_v11 = vsel %vm709_vm9, %v711_v7, %v707_v9  ;;  %v722_v12 = vsel %vm721_vm10, %v1394_v55, %v718_v8 }
 0x38b   :  { %v727_v13 = vsel %vm724_vm11, %v726_v10, %v722_v12  ;;  %729 = vst [vmem:[#allocation11] sm:$0xff] %v712_v11 }
 0x38c   :  { %730 = vst [vmem:[#allocation11 + $0x8] sm:$0xff] %v727_v13 }
 0x38d   :  { %930 = dma.vmem_to_hbm [thread:$0]  %s926_s22, 256, %s928_s25, [#allocation12]  }
 0x38e   :  { %941 = dma.vmem_to_hbm [thread:$0]  %s937_s27, 128, %s939_s30, [#allocation12]  }
 0x38f   :  { %1569 = dma.done.wait [#allocation4], 128  }
 0x390   :  { %1570 = vsyncadd [#allocation4], 4294967168 }
 0x391   :  { %1571 = dma.done.wait [#allocation12], 384  }
 0x392   :  { %1572 = vsyncadd [#allocation12], 4294966912 }
 0x393   :  { %954 = vsyncpa [#allocation3], 1 }
 0x394   :  { %955 = vsyncpa [#allocation6], 1 }
 0x395   :  { %956 = vsyncpa [#allocation9], 1 }
 0x396   :  { %957 = vsyncpa [#allocation4], 1 }
 0x397   :  { %958 = vsyncpa [#allocation12], 1 }

</bundles_post_ra>
